<compile_context>
chip_gen: v5e
topology: v5e:2x2
jax: 0.10.0
libtpu: 0.0.40
codegen_flags: <defaults>
</compile_context>

<pallas_src>
import functools

import jax
import jax.numpy as jnp
from jax.experimental import pallas as pl
from jax.experimental.pallas import tpu as pltpu

RELU_SLOPE = 0.1


def _round_up(x, m):
    return (x + m - 1) // m * m


@functools.lru_cache(maxsize=None)
def _roll_matches_numpy(backend: str) -> bool:
    """One-time probe of pltpu.roll's shift convention, keyed by backend.

    The conv taps need s[:, q] = x[:, (q + off) % L]; with jnp.roll semantics that is
    shift = -off.  Falls back to assuming jnp.roll semantics if the probe can't run."""
    try:
        def k(x_ref, o_ref):
            o_ref[...] = pltpu.roll(x_ref[...], 1, axis=1)

        x = jnp.arange(8 * 128, dtype=jnp.float32).reshape(8, 128)
        y = pl.pallas_call(k, out_shape=jax.ShapeDtypeStruct((8, 128), jnp.float32))(x)
        return bool(y[0, 1] == x[0, 0])
    except Exception:  # pragma: no cover - non-TPU / interpret-only environments
        return True


def _unet_block_kernel(x_ref, m_ref, w1_ref, b1_ref, w2_ref, b2_ref,
                       out_ref, stack_ref, *, W, roll_fwd):
    # x_ref    : (1, Cin_p, L)        f32; L = nb*H*W, channels on sublanes, pixels on lanes
    # m_ref    : (8, L)               f32 {0,1} border masks for the 8 non-center taps
    # w1_ref   : (2*Cout_p, 9*Cin_p)  conv_1 weights (tap-major) with the 1x1 identity conv
    #                                 embedded at the center-tap columns of the lower rows
    # b1_ref   : (2*Cout_p, 1)        [b1 ; b_identity]  (f32)
    # w2_ref   : (Cout_p, 9*Cout_p)   conv_2 weights (tap-major)
    # b2_ref   : (Cout_p, 1)
    # out_ref  : (1, Cout_p, L)       f32, lane-dense output block
    # stack_ref: (9*max(Cin_p,Cout_p), L) compute-dtype im2col slab
    cout_p = w2_ref.shape[0]

    def conv3x3(inp, w_all, b):
        # inp: (C, L) f32 -> (rows(w_all), L) f32 as ONE MXU matmul over the 9 stacked taps.
        C, L = inp.shape
        mrow = 0
        for k in range(9):
            dy, dx = k // 3 - 1, k % 3 - 1
            if k == 4:
                s = inp                                    # center tap: never out of bounds
            else:
                off = dy * W + dx                          # flat lane offset of tap k
                shift = (-off) % L if roll_fwd else off % L
                s = pltpu.roll(inp, shift, axis=1)         # XLU lane rotation (cheap)
                s = s * m_ref[mrow:mrow + 1, :]            # zero OOB + wrapped pixels
                mrow += 1
            # Per-tap cast into the compute-dtype slab; C is padded to the sublane tile so
            # every store is a full, unmasked vst.
            stack_ref[k * C:(k + 1) * C, :] = s.astype(stack_ref.dtype)
        stacked = stack_ref[0:9 * C, :]                    # (9*C, L), already compute dtype
        return jnp.dot(w_all, stacked, preferred_element_type=jnp.float32) + b

    x = x_ref[0]                                           # (Cin_p, L) f32

    # conv_1 and the 1x1 identity branch share a single matmul (identity rides the center tap).
    res1 = conv3x3(x, w1_ref[...], b1_ref[...])            # (2*Cout_p, L) f32
    out1 = res1[:cout_p]
    ident = res1[cout_p:]
    out1 = jnp.where(out1 >= 0, out1, RELU_SLOPE * out1)   # leaky relu in f32 (VPU)

    # NOTE: stack_ref rows beyond those conv_2 rewrites below may hold stale conv_1 data,
    # but conv3x3 rewrites every row it feeds to the matmul before reading it, so it's safe.
    out2 = conv3x3(out1, w2_ref[...], b2_ref[...])         # (Cout_p, L) f32
    out2 = jnp.where(out2 >= 0, out2, RELU_SLOPE * out2)

    out_ref[0] = (out2 + ident).astype(out_ref.dtype)


@functools.partial(jax.jit, static_argnames=("compute_dtype", "roll_fwd"))
def _unet_conv_block_impl(x_nchw, w1, b1, w2, b2, wid, bid, *, compute_dtype, roll_fwd):
    N, Cin, H, W = x_nchw.shape
    Cout = w1.shape[0]
    HW = H * W
    comp = jnp.dtype(compute_dtype)

    # Channel padding so every per-tap slab store lands on whole (sublane, 128) tiles:
    # 8 rows for f32 operands, 16 for bf16 (sub-32-bit packs 2 rows per sublane).
    cmult = 8 if comp.itemsize >= 4 else 16
    Cin_p = _round_up(Cin, cmult)
    Cout_p = _round_up(Cout, cmult)
    cmax_p = max(Cin_p, Cout_p)

    # Batch nb images per grid step (longer MXU lane dim, fewer ~0.35us step overheads),
    # keeping >=2 grid steps for megacore split / pipeline overlap and a VMEM budget sized
    # off v7x's 64 MiB (not v6e's 128 MiB).
    def pick_nb():
        budget = 24 * 2 ** 20
        best = 1
        for nb in range(1, N + 1):
            if N % nb:
                continue
            if N >= 2 and N // nb < 2:
                continue
            L = nb * HW
            need = (9 * cmax_p * L * comp.itemsize     # im2col slab
                    + 2 * (Cin_p + Cout_p) * L * 4     # double-buffered in/out blocks (f32)
                    + 12 * Cout_p * L * 4)             # f32 intermediates
            if need <= budget:
                best = max(best, nb)
        return best

    nb = pick_nb()
    Ngrp = N // nb
    L = nb * HW

    # Activations stay NCHW: a reshape puts pixels on the 128-lane axis.  For nb > 1 the
    # small (Ngrp, nb, C, HW) -> (Ngrp, C, nb*HW) transpose is only taken when HW is small
    # enough that per-step overhead dominates.
    x = x_nchw.astype(jnp.float32).reshape(N, Cin, HW)
    x = jnp.pad(x, ((0, 0), (0, Cin_p - Cin), (0, 0)))
    x = x.reshape(Ngrp, nb, Cin_p, HW).transpose(0, 2, 1, 3).reshape(Ngrp, Cin_p, L)

    # torch (Cout, C, 3, 3) -> (Cout_p, 9*C_p), tap-major: [co, k*C_p + ci] = w[co, ci, ky, kx]
    def stack3x3(w, c_in_p, c_out_p):
        co, ci = w.shape[0], w.shape[1]
        wt = jnp.transpose(w, (0, 2, 3, 1))                # (co, ky, kx, ci)
        wt = jnp.pad(wt, ((0, c_out_p - co), (0, 0), (0, 0), (0, c_in_p - ci)))
        return wt.reshape(c_out_p, 9 * c_in_p)

    w1s = stack3x3(w1, Cin_p, Cout_p)
    # 1x1 identity conv fused into the conv_1 matmul: it rides the (unmasked) center tap.
    wid_embed = jnp.zeros((Cout_p, 9 * Cin_p), jnp.float32)
    wid_embed = wid_embed.at[:Cout, 4 * Cin_p:4 * Cin_p + Cin].set(wid.reshape(Cout, Cin))
    w1f = jnp.concatenate([w1s, wid_embed], axis=0).astype(compute_dtype)  # (2*Cout_p, 9*Cin_p)
    w2s = stack3x3(w2, Cout_p, Cout_p).astype(compute_dtype)

    def pad_bias(b):
        return jnp.pad(b.astype(jnp.float32), (0, Cout_p - Cout)).reshape(Cout_p, 1)

    b1f = jnp.concatenate([pad_bias(b1), pad_bias(bid)], axis=0)           # (2*Cout_p, 1)
    b2c = pad_bias(b2)

    # Border masks for the 8 non-center taps, built once and DMA'd once (constant index_map).
    q = jnp.arange(HW, dtype=jnp.int32)
    qy, qx = q // W, q % W
    rows = []
    for k in range(9):
        if k == 4:
            continue
        dy, dx = k // 3 - 1, k % 3 - 1
        rows.append(((qy + dy >= 0) & (qy + dy < H) &
                     (qx + dx >= 0) & (qx + dx < W)).astype(jnp.float32))
    masks = jnp.tile(jnp.stack(rows, axis=0), (1, nb))                     # (8, L)

    kernel = functools.partial(_unet_block_kernel, W=W, roll_fwd=roll_fwd)

    flops = int(2 * N * HW * Cout * (9 * Cin + Cin + 9 * Cout))
    bytes_accessed = int(x.size * 4 + masks.size * 4 + b1f.size * 4 + b2c.size * 4
                         + (w1f.size + w2s.size) * comp.itemsize
                         + Ngrp * Cout_p * L * 4)
    need = int(9 * cmax_p * L * comp.itemsize
               + 2 * (Cin_p + Cout_p) * L * 4
               + 12 * Cout_p * L * 4
               + 8 * L * 4
               + 2 * (w1f.size + w2s.size) * comp.itemsize)
    vmem_limit = int(min(64 * 2 ** 20, max(32 * 2 ** 20, 2 * need)))

    out = pl.pallas_call(
        kernel,
        out_shape=jax.ShapeDtypeStruct((Ngrp, Cout_p, L), jnp.float32),
        grid=(Ngrp,),
        in_specs=[
            pl.BlockSpec((1, Cin_p, L), lambda n: (n, 0, 0)),
            pl.BlockSpec((8, L), lambda n: (0, 0)),
            pl.BlockSpec((2 * Cout_p, 9 * Cin_p), lambda n: (0, 0)),
            pl.BlockSpec((2 * Cout_p, 1), lambda n: (0, 0)),
            pl.BlockSpec((Cout_p, 9 * Cout_p), lambda n: (0, 0)),
            pl.BlockSpec((Cout_p, 1), lambda n: (0, 0)),
        ],
        out_specs=pl.BlockSpec((1, Cout_p, L), lambda n: (n, 0, 0)),
        scratch_shapes=[pltpu.VMEM((9 * cmax_p, L), compute_dtype)],
        compiler_params=pltpu.CompilerParams(
            dimension_semantics=("parallel",),
            vmem_limit_bytes=vmem_limit),
        cost_estimate=pl.CostEstimate(flops=flops, transcendentals=0,
                                      bytes_accessed=bytes_accessed),
    )(x, masks, w1f, b1f, w2s, b2c)

    out = out.reshape(Ngrp, Cout_p, nb, HW).transpose(0, 2, 1, 3).reshape(N, Cout_p, HW)
    return out[:, :Cout].reshape(N, Cout, H, W)


def unet_conv_block(x_nchw, w1, b1, w2, b2, wid, bid, *, compute_dtype=jnp.float32):
    """UNetConvBlock forward. x: (N, Cin, H, W); torch-layout params:
    w1 (Cout, Cin, 3, 3), w2 (Cout, Cout, 3, 3), wid (Cout, Cin, 1, 1), biases (Cout,).
    compute_dtype=jnp.bfloat16 runs the MXU matmuls with bf16 operands (f32 accumulation,
    f32 elementwise); recommended on v5e/v6e/v7x for MXU throughput."""
    return _unet_conv_block_impl(x_nchw, w1, b1, w2, b2, wid, bid,
                                 compute_dtype=compute_dtype,
                                 roll_fwd=_roll_matches_numpy(jax.default_backend()))


def _reference(x, w1, b1, w2, b2, wid, bid):
    """Pure-JAX (lax.conv) reference mirroring the PyTorch UNetConvBlock.forward."""
    def conv(inp, w, b):
        y = jax.lax.conv_general_dilated(
            inp, w, window_strides=(1, 1), padding="SAME",
            dimension_numbers=("NCHW", "OIHW", "NCHW"),
            precision=jax.lax.Precision.HIGHEST)
        return y + b.reshape(1, -1, 1, 1)

    def lrelu(v):
        return jnp.where(v >= 0, v, RELU_SLOPE * v)

    out = lrelu(conv(x, w1, b1))
    out = lrelu(conv(out, w2, b2))
    return out + conv(x, wid, bid)


if __name__ == "__main__":
    key = jax.random.PRNGKey(0)
    N, Cin, Cout, H, W = 2, 4, 8, 16, 16
    ks = jax.random.split(key, 7)
    x = jax.random.normal(ks[0], (N, Cin, H, W), jnp.float32)
    w1 = jax.random.normal(ks[1], (Cout, Cin, 3, 3), jnp.float32) * 0.1
    b1 = jax.random.normal(ks[2], (Cout,), jnp.float32) * 0.1
    w2 = jax.random.normal(ks[3], (Cout, Cout, 3, 3), jnp.float32) * 0.1
    b2 = jax.random.normal(ks[4], (Cout,), jnp.float32) * 0.1
    wid = jax.random.normal(ks[5], (Cout, Cin, 1, 1), jnp.float32) * 0.1
    bid = jax.random.normal(ks[6], (Cout,), jnp.float32) * 0.1

    # f32 path (N=2 -> one image per grid step, 2 steps).
    ref = _reference(x, w1, b1, w2, b2, wid, bid)
    out = jax.block_until_ready(unet_conv_block(x, w1, b1, w2, b2, wid, bid))
    assert out.shape == (N, Cout, H, W)
    err = float(jnp.max(jnp.abs(out - ref)))
    assert err < 1e-3, f"f32 path max err {err}"

    # bf16-operand MXU path with batched grid steps (N=4 -> 2 images per step, 2 steps);
    # accumulation & elementwise stay f32.
    x4 = jnp.concatenate([x, x * 0.5], axis=0)
    ref4 = _reference(x4, w1, b1, w2, b2, wid, bid)
    out_bf16 = jax.block_until_ready(
        unet_conv_block(x4, w1, b1, w2, b2, wid, bid, compute_dtype=jnp.bfloat16))
    err_bf16 = float(jnp.max(jnp.abs(out_bf16 - ref4)))
    assert err_bf16 < 1e-1, f"bf16 path max err {err_bf16}"

    print("KERNEL_OK")
</pallas_src>

<mosaic_0001>
module attributes {stable_mosaic.version = 11 : i64} {
  func.func @k(%arg0: memref<8x128xf32, #tpu.memory_space<vmem>>, %arg1: memref<8x128xf32, #tpu.memory_space<vmem>>) attributes {dimension_semantics = [], scalar_prefetch = 0 : i64, scratch_operands = 0 : i64, tpu.core_type = #tpu.core_type<tc>} {
    %c0 = arith.constant 0 : index
    %c0_0 = arith.constant 0 : index
    %0 = vector.load %arg0[%c0, %c0_0] : memref<8x128xf32, #tpu.memory_space<vmem>>, vector<8x128xf32>
    %c1_i32 = arith.constant 1 : i32
    %1 = tpu.dynamic_rotate %0 by %c1_i32 dim 1 : vector<8x128xf32>, i32 -> vector<8x128xf32>
    %c0_1 = arith.constant 0 : index
    %c0_2 = arith.constant 0 : index
    %2 = vector.load %arg1[%c0_1, %c0_2] : memref<8x128xf32, #tpu.memory_space<vmem>>, vector<8x128xf32>
    tpu.vector_store %arg1[%c0_1, %c0_2], %1 {strides = array<i32>} : memref<8x128xf32, #tpu.memory_space<vmem>>, vector<8x128xf32>,
    return
  }
}

module attributes {stable_mosaic.version = 11 : i64} {
  func.func @_unet_block_kernel(%arg0: i32, %arg1: memref<1x8x256xf32, #tpu.memory_space<vmem>>, %arg2: memref<8x256xf32, #tpu.memory_space<vmem>>, %arg3: memref<16x72xf32, #tpu.memory_space<vmem>>, %arg4: memref<16x1xf32, #tpu.memory_space<vmem>>, %arg5: memref<8x72xf32, #tpu.memory_space<vmem>>, %arg6: memref<8x1xf32, #tpu.memory_space<vmem>>, %arg7: memref<1x8x256xf32, #tpu.memory_space<vmem>>, %arg8: memref<72x256xf32, #tpu.memory_space<vmem>>) attributes {dimension_semantics = [#tpu.dimension_semantics<parallel>], iteration_bounds = array<i64: 2>, scalar_prefetch = 0 : i64, scratch_operands = 1 : i64, tpu.core_type = #tpu.core_type<tc>, window_params = [{transform_indices = @transform_0, window_bounds = array<i64: 1, 8, 256>}, {pipeline_mode = #tpu.pipeline_mode<synchronous>, transform_indices = @transform_1, window_bounds = array<i64: 8, 256>}, {pipeline_mode = #tpu.pipeline_mode<synchronous>, transform_indices = @transform_2, window_bounds = array<i64: 16, 72>}, {pipeline_mode = #tpu.pipeline_mode<synchronous>, transform_indices = @transform_3, window_bounds = array<i64: 16, 1>}, {pipeline_mode = #tpu.pipeline_mode<synchronous>, transform_indices = @transform_4, window_bounds = array<i64: 8, 72>}, {pipeline_mode = #tpu.pipeline_mode<synchronous>, transform_indices = @transform_5, window_bounds = array<i64: 8, 1>}, {transform_indices = @transform_6, window_bounds = array<i64: 1, 8, 256>}]} {
    %c0 = arith.constant 0 : index
    %c0_0 = arith.constant 0 : index
    %c0_1 = arith.constant 0 : index
    %0 = vector.load %arg1[%c0, %c0_0, %c0_1] : memref<1x8x256xf32, #tpu.memory_space<vmem>>, vector<1x8x256xf32>
    %1 = vector.shape_cast %0 : vector<1x8x256xf32> to vector<8x256xf32>
    %c0_2 = arith.constant 0 : index
    %c0_3 = arith.constant 0 : index
    %2 = vector.load %arg3[%c0_2, %c0_3] : memref<16x72xf32, #tpu.memory_space<vmem>>, vector<16x72xf32>
    %c0_4 = arith.constant 0 : index
    %c0_5 = arith.constant 0 : index
    %3 = vector.load %arg4[%c0_4, %c0_5] : memref<16x1xf32, #tpu.memory_space<vmem>>, vector<16x1xf32>
    %c17_i32 = arith.constant 17 : i32
    %4 = tpu.dynamic_rotate %1 by %c17_i32 dim 1 : vector<8x256xf32>, i32 -> vector<8x256xf32>
    %c0_6 = arith.constant 0 : index
    %c0_7 = arith.constant 0 : index
    %5 = vector.load %arg2[%c0_6, %c0_7] : memref<8x256xf32, #tpu.memory_space<vmem>>, vector<1x256xf32>
    %6 = vector.broadcast %5 : vector<1x256xf32> to vector<8x256xf32>
    %7 = arith.mulf %4, %6 : vector<8x256xf32>
    %c0_8 = arith.constant 0 : index
    %c0_9 = arith.constant 0 : index
    %8 = vector.load %arg8[%c0_8, %c0_9] : memref<72x256xf32, #tpu.memory_space<vmem>>, vector<8x256xf32>
    tpu.vector_store %arg8[%c0_8, %c0_9], %7 {strides = array<i32>} : memref<72x256xf32, #tpu.memory_space<vmem>>, vector<8x256xf32>,
    %c16_i32 = arith.constant 16 : i32
    %9 = tpu.dynamic_rotate %1 by %c16_i32 dim 1 : vector<8x256xf32>, i32 -> vector<8x256xf32>
    %c1 = arith.constant 1 : index
    %c0_10 = arith.constant 0 : index
    %10 = vector.load %arg2[%c1, %c0_10] : memref<8x256xf32, #tpu.memory_space<vmem>>, vector<1x256xf32>
    %11 = vector.broadcast %10 : vector<1x256xf32> to vector<8x256xf32>
    %12 = arith.mulf %9, %11 : vector<8x256xf32>
    %c8 = arith.constant 8 : index
    %c0_11 = arith.constant 0 : index
    %13 = vector.load %arg8[%c8, %c0_11] : memref<72x256xf32, #tpu.memory_space<vmem>>, vector<8x256xf32>
    tpu.vector_store %arg8[%c8, %c0_11], %12 {strides = array<i32>} : memref<72x256xf32, #tpu.memory_space<vmem>>, vector<8x256xf32>,
    %c15_i32 = arith.constant 15 : i32
    %14 = tpu.dynamic_rotate %1 by %c15_i32 dim 1 : vector<8x256xf32>, i32 -> vector<8x256xf32>
    %c2 = arith.constant 2 : index
    %c0_12 = arith.constant 0 : index
    %15 = vector.load %arg2[%c2, %c0_12] : memref<8x256xf32, #tpu.memory_space<vmem>>, vector<1x256xf32>
    %16 = vector.broadcast %15 : vector<1x256xf32> to vector<8x256xf32>
    %17 = arith.mulf %14, %16 : vector<8x256xf32>
    %c16 = arith.constant 16 : index
    %c0_13 = arith.constant 0 : index
    %18 = vector.load %arg8[%c16, %c0_13] : memref<72x256xf32, #tpu.memory_space<vmem>>, vector<8x256xf32>
    tpu.vector_store %arg8[%c16, %c0_13], %17 {strides = array<i32>} : memref<72x256xf32, #tpu.memory_space<vmem>>, vector<8x256xf32>,
    %c1_i32 = arith.constant 1 : i32
    %19 = tpu.dynamic_rotate %1 by %c1_i32 dim 1 : vector<8x256xf32>, i32 -> vector<8x256xf32>
    %c3 = arith.constant 3 : index
    %c0_14 = arith.constant 0 : index
    %20 = vector.load %arg2[%c3, %c0_14] : memref<8x256xf32, #tpu.memory_space<vmem>>, vector<1x256xf32>
    %21 = vector.broadcast %20 : vector<1x256xf32> to vector<8x256xf32>
    %22 = arith.mulf %19, %21 : vector<8x256xf32>
    %c24 = arith.constant 24 : index
    %c0_15 = arith.constant 0 : index
    %23 = vector.load %arg8[%c24, %c0_15] : memref<72x256xf32, #tpu.memory_space<vmem>>, vector<8x256xf32>
    tpu.vector_store %arg8[%c24, %c0_15], %22 {strides = array<i32>} : memref<72x256xf32, #tpu.memory_space<vmem>>, vector<8x256xf32>,
    %c32 = arith.constant 32 : index
    %c0_16 = arith.constant 0 : index
    %24 = vector.load %arg8[%c32, %c0_16] : memref<72x256xf32, #tpu.memory_space<vmem>>, vector<8x256xf32>
    tpu.vector_store %arg8[%c32, %c0_16], %1 {strides = array<i32>} : memref<72x256xf32, #tpu.memory_space<vmem>>, vector<8x256xf32>,
    %c255_i32 = arith.constant 255 : i32
    %25 = tpu.dynamic_rotate %1 by %c255_i32 dim 1 : vector<8x256xf32>, i32 -> vector<8x256xf32>
    %c4 = arith.constant 4 : index
    %c0_17 = arith.constant 0 : index
    %26 = vector.load %arg2[%c4, %c0_17] : memref<8x256xf32, #tpu.memory_space<vmem>>, vector<1x256xf32>
    %27 = vector.broadcast %26 : vector<1x256xf32> to vector<8x256xf32>
    %28 = arith.mulf %25, %27 : vector<8x256xf32>
    %c40 = arith.constant 40 : index
    %c0_18 = arith.constant 0 : index
    %29 = vector.load %arg8[%c40, %c0_18] : memref<72x256xf32, #tpu.memory_space<vmem>>, vector<8x256xf32>
    tpu.vector_store %arg8[%c40, %c0_18], %28 {strides = array<i32>} : memref<72x256xf32, #tpu.memory_space<vmem>>, vector<8x256xf32>,
    %c241_i32 = arith.constant 241 : i32
    %30 = tpu.dynamic_rotate %1 by %c241_i32 dim 1 : vector<8x256xf32>, i32 -> vector<8x256xf32>
    %c5 = arith.constant 5 : index
    %c0_19 = arith.constant 0 : index
    %31 = vector.load %arg2[%c5, %c0_19] : memref<8x256xf32, #tpu.memory_space<vmem>>, vector<1x256xf32>
    %32 = vector.broadcast %31 : vector<1x256xf32> to vector<8x256xf32>
    %33 = arith.mulf %30, %32 : vector<8x256xf32>
    %c48 = arith.constant 48 : index
    %c0_20 = arith.constant 0 : index
    %34 = vector.load %arg8[%c48, %c0_20] : memref<72x256xf32, #tpu.memory_space<vmem>>, vector<8x256xf32>
    tpu.vector_store %arg8[%c48, %c0_20], %33 {strides = array<i32>} : memref<72x256xf32, #tpu.memory_space<vmem>>, vector<8x256xf32>,
    %c240_i32 = arith.constant 240 : i32
    %35 = tpu.dynamic_rotate %1 by %c240_i32 dim 1 : vector<8x256xf32>, i32 -> vector<8x256xf32>
    %c6 = arith.constant 6 : index
    %c0_21 = arith.constant 0 : index
    %36 = vector.load %arg2[%c6, %c0_21] : memref<8x256xf32, #tpu.memory_space<vmem>>, vector<1x256xf32>
    %37 = vector.broadcast %36 : vector<1x256xf32> to vector<8x256xf32>
    %38 = arith.mulf %35, %37 : vector<8x256xf32>
    %c56 = arith.constant 56 : index
    %c0_22 = arith.constant 0 : index
    %39 = vector.load %arg8[%c56, %c0_22] : memref<72x256xf32, #tpu.memory_space<vmem>>, vector<8x256xf32>
    tpu.vector_store %arg8[%c56, %c0_22], %38 {strides = array<i32>} : memref<72x256xf32, #tpu.memory_space<vmem>>, vector<8x256xf32>,
    %c239_i32 = arith.constant 239 : i32
    %40 = tpu.dynamic_rotate %1 by %c239_i32 dim 1 : vector<8x256xf32>, i32 -> vector<8x256xf32>
    %c7 = arith.constant 7 : index
    %c0_23 = arith.constant 0 : index
    %41 = vector.load %arg2[%c7, %c0_23] : memref<8x256xf32, #tpu.memory_space<vmem>>, vector<1x256xf32>
    %42 = vector.broadcast %41 : vector<1x256xf32> to vector<8x256xf32>
    %43 = arith.mulf %40, %42 : vector<8x256xf32>
    %c64 = arith.constant 64 : index
    %c0_24 = arith.constant 0 : index
    %44 = vector.load %arg8[%c64, %c0_24] : memref<72x256xf32, #tpu.memory_space<vmem>>, vector<8x256xf32>
    tpu.vector_store %arg8[%c64, %c0_24], %43 {strides = array<i32>} : memref<72x256xf32, #tpu.memory_space<vmem>>, vector<8x256xf32>,
    %c0_25 = arith.constant 0 : index
    %c0_26 = arith.constant 0 : index
    %45 = vector.load %arg8[%c0_25, %c0_26] : memref<72x256xf32, #tpu.memory_space<vmem>>, vector<72x256xf32>
    %cst = arith.constant dense<0.000000e+00> : vector<16x256xf32>
    %46 = tpu.matmul %2, %45, %cst {dimension_numbers = #tpu.dot_dimension_numbers<[1], [0], [0], [1], [0, 0, 1, 1], [], []>} : vector<16x72xf32>, vector<72x256xf32>, vector<16x256xf32> -> vector<16x256xf32>
    %47 = vector.broadcast %3 : vector<16x1xf32> to vector<16x256xf32>
    %48 = arith.addf %46, %47 : vector<16x256xf32>
    %49 = vector.extract_strided_slice %48 {offsets = [0, 0], sizes = [8, 256], strides = [1, 1]} : vector<16x256xf32> to vector<8x256xf32>
    %50 = vector.extract_strided_slice %48 {offsets = [8, 0], sizes = [8, 256], strides = [1, 1]} : vector<16x256xf32> to vector<8x256xf32>
    %cst_27 = arith.constant 0.000000e+00 : f32
    %51 = vector.broadcast %cst_27 : f32 to vector<8x256xf32>
    %52 = arith.cmpf oge, %49, %51 : vector<8x256xf32>
    %cst_28 = arith.constant 1.000000e-01 : f32
    %53 = vector.broadcast %cst_28 : f32 to vector<8x256xf32>
    %54 = arith.mulf %53, %49 : vector<8x256xf32>
    %55 = arith.select %52, %49, %54 : vector<8x256xi1>, vector<8x256xf32>
    %c0_29 = arith.constant 0 : index
    %c0_30 = arith.constant 0 : index
    %56 = vector.load %arg5[%c0_29, %c0_30] : memref<8x72xf32, #tpu.memory_space<vmem>>, vector<8x72xf32>
    %c0_31 = arith.constant 0 : index
    %c0_32 = arith.constant 0 : index
    %57 = vector.load %arg6[%c0_31, %c0_32] : memref<8x1xf32, #tpu.memory_space<vmem>>, vector<8x1xf32>
    %c17_i32_33 = arith.constant 17 : i32
    %58 = tpu.dynamic_rotate %55 by %c17_i32_33 dim 1 : vector<8x256xf32>, i32 -> vector<8x256xf32>
    %c0_34 = arith.constant 0 : index
    %c0_35 = arith.constant 0 : index
    %59 = vector.load %arg2[%c0_34, %c0_35] : memref<8x256xf32, #tpu.memory_space<vmem>>, vector<1x256xf32>
    %60 = vector.broadcast %59 : vector<1x256xf32> to vector<8x256xf32>
    %61 = arith.mulf %58, %60 : vector<8x256xf32>
    %c0_36 = arith.constant 0 : index
    %c0_37 = arith.constant 0 : index
    %62 = vector.load %arg8[%c0_36, %c0_37] : memref<72x256xf32, #tpu.memory_space<vmem>>, vector<8x256xf32>
    tpu.vector_store %arg8[%c0_36, %c0_37], %61 {strides = array<i32>} : memref<72x256xf32, #tpu.memory_space<vmem>>, vector<8x256xf32>,
    %c16_i32_38 = arith.constant 16 : i32
    %63 = tpu.dynamic_rotate %55 by %c16_i32_38 dim 1 : vector<8x256xf32>, i32 -> vector<8x256xf32>
    %c1_39 = arith.constant 1 : index
    %c0_40 = arith.constant 0 : index
    %64 = vector.load %arg2[%c1_39, %c0_40] : memref<8x256xf32, #tpu.memory_space<vmem>>, vector<1x256xf32>
    %65 = vector.broadcast %64 : vector<1x256xf32> to vector<8x256xf32>
    %66 = arith.mulf %63, %65 : vector<8x256xf32>
    %c8_41 = arith.constant 8 : index
    %c0_42 = arith.constant 0 : index
    %67 = vector.load %arg8[%c8_41, %c0_42] : memref<72x256xf32, #tpu.memory_space<vmem>>, vector<8x256xf32>
    tpu.vector_store %arg8[%c8_41, %c0_42], %66 {strides = array<i32>} : memref<72x256xf32, #tpu.memory_space<vmem>>, vector<8x256xf32>,
    %c15_i32_43 = arith.constant 15 : i32
    %68 = tpu.dynamic_rotate %55 by %c15_i32_43 dim 1 : vector<8x256xf32>, i32 -> vector<8x256xf32>
    %c2_44 = arith.constant 2 : index
    %c0_45 = arith.constant 0 : index
    %69 = vector.load %arg2[%c2_44, %c0_45] : memref<8x256xf32, #tpu.memory_space<vmem>>, vector<1x256xf32>
    %70 = vector.broadcast %69 : vector<1x256xf32> to vector<8x256xf32>
    %71 = arith.mulf %68, %70 : vector<8x256xf32>
    %c16_46 = arith.constant 16 : index
    %c0_47 = arith.constant 0 : index
    %72 = vector.load %arg8[%c16_46, %c0_47] : memref<72x256xf32, #tpu.memory_space<vmem>>, vector<8x256xf32>
    tpu.vector_store %arg8[%c16_46, %c0_47], %71 {strides = array<i32>} : memref<72x256xf32, #tpu.memory_space<vmem>>, vector<8x256xf32>,
    %c1_i32_48 = arith.constant 1 : i32
    %73 = tpu.dynamic_rotate %55 by %c1_i32_48 dim 1 : vector<8x256xf32>, i32 -> vector<8x256xf32>
    %c3_49 = arith.constant 3 : index
    %c0_50 = arith.constant 0 : index
    %74 = vector.load %arg2[%c3_49, %c0_50] : memref<8x256xf32, #tpu.memory_space<vmem>>, vector<1x256xf32>
    %75 = vector.broadcast %74 : vector<1x256xf32> to vector<8x256xf32>
    %76 = arith.mulf %73, %75 : vector<8x256xf32>
    %c24_51 = arith.constant 24 : index
    %c0_52 = arith.constant 0 : index
    %77 = vector.load %arg8[%c24_51, %c0_52] : memref<72x256xf32, #tpu.memory_space<vmem>>, vector<8x256xf32>
    tpu.vector_store %arg8[%c24_51, %c0_52], %76 {strides = array<i32>} : memref<72x256xf32, #tpu.memory_space<vmem>>, vector<8x256xf32>,
    %c32_53 = arith.constant 32 : index
    %c0_54 = arith.constant 0 : index
    %78 = vector.load %arg8[%c32_53, %c0_54] : memref<72x256xf32, #tpu.memory_space<vmem>>, vector<8x256xf32>
    tpu.vector_store %arg8[%c32_53, %c0_54], %55 {strides = array<i32>} : memref<72x256xf32, #tpu.memory_space<vmem>>, vector<8x256xf32>,
    %c255_i32_55 = arith.constant 255 : i32
    %79 = tpu.dynamic_rotate %55 by %c255_i32_55 dim 1 : vector<8x256xf32>, i32 -> vector<8x256xf32>
    %c4_56 = arith.constant 4 : index
    %c0_57 = arith.constant 0 : index
    %80 = vector.load %arg2[%c4_56, %c0_57] : memref<8x256xf32, #tpu.memory_space<vmem>>, vector<1x256xf32>
    %81 = vector.broadcast %80 : vector<1x256xf32> to vector<8x256xf32>
    %82 = arith.mulf %79, %81 : vector<8x256xf32>
    %c40_58 = arith.constant 40 : index
    %c0_59 = arith.constant 0 : index
    %83 = vector.load %arg8[%c40_58, %c0_59] : memref<72x256xf32, #tpu.memory_space<vmem>>, vector<8x256xf32>
    tpu.vector_store %arg8[%c40_58, %c0_59], %82 {strides = array<i32>} : memref<72x256xf32, #tpu.memory_space<vmem>>, vector<8x256xf32>,
    %c241_i32_60 = arith.constant 241 : i32
    %84 = tpu.dynamic_rotate %55 by %c241_i32_60 dim 1 : vector<8x256xf32>, i32 -> vector<8x256xf32>
    %c5_61 = arith.constant 5 : index
    %c0_62 = arith.constant 0 : index
    %85 = vector.load %arg2[%c5_61, %c0_62] : memref<8x256xf32, #tpu.memory_space<vmem>>, vector<1x256xf32>
    %86 = vector.broadcast %85 : vector<1x256xf32> to vector<8x256xf32>
    %87 = arith.mulf %84, %86 : vector<8x256xf32>
    %c48_63 = arith.constant 48 : index
    %c0_64 = arith.constant 0 : index
    %88 = vector.load %arg8[%c48_63, %c0_64] : memref<72x256xf32, #tpu.memory_space<vmem>>, vector<8x256xf32>
    tpu.vector_store %arg8[%c48_63, %c0_64], %87 {strides = array<i32>} : memref<72x256xf32, #tpu.memory_space<vmem>>, vector<8x256xf32>,
    %c240_i32_65 = arith.constant 240 : i32
    %89 = tpu.dynamic_rotate %55 by %c240_i32_65 dim 1 : vector<8x256xf32>, i32 -> vector<8x256xf32>
    %c6_66 = arith.constant 6 : index
    %c0_67 = arith.constant 0 : index
    %90 = vector.load %arg2[%c6_66, %c0_67] : memref<8x256xf32, #tpu.memory_space<vmem>>, vector<1x256xf32>
    %91 = vector.broadcast %90 : vector<1x256xf32> to vector<8x256xf32>
    %92 = arith.mulf %89, %91 : vector<8x256xf32>
    %c56_68 = arith.constant 56 : index
    %c0_69 = arith.constant 0 : index
    %93 = vector.load %arg8[%c56_68, %c0_69] : memref<72x256xf32, #tpu.memory_space<vmem>>, vector<8x256xf32>
    tpu.vector_store %arg8[%c56_68, %c0_69], %92 {strides = array<i32>} : memref<72x256xf32, #tpu.memory_space<vmem>>, vector<8x256xf32>,
    %c239_i32_70 = arith.constant 239 : i32
    %94 = tpu.dynamic_rotate %55 by %c239_i32_70 dim 1 : vector<8x256xf32>, i32 -> vector<8x256xf32>
    %c7_71 = arith.constant 7 : index
    %c0_72 = arith.constant 0 : index
    %95 = vector.load %arg2[%c7_71, %c0_72] : memref<8x256xf32, #tpu.memory_space<vmem>>, vector<1x256xf32>
    %96 = vector.broadcast %95 : vector<1x256xf32> to vector<8x256xf32>
    %97 = arith.mulf %94, %96 : vector<8x256xf32>
    %c64_73 = arith.constant 64 : index
    %c0_74 = arith.constant 0 : index
    %98 = vector.load %arg8[%c64_73, %c0_74] : memref<72x256xf32, #tpu.memory_space<vmem>>, vector<8x256xf32>
    tpu.vector_store %arg8[%c64_73, %c0_74], %97 {strides = array<i32>} : memref<72x256xf32, #tpu.memory_space<vmem>>, vector<8x256xf32>,
    %c0_75 = arith.constant 0 : index
    %c0_76 = arith.constant 0 : index
    %99 = vector.load %arg8[%c0_75, %c0_76] : memref<72x256xf32, #tpu.memory_space<vmem>>, vector<72x256xf32>
    %cst_77 = arith.constant dense<0.000000e+00> : vector<8x256xf32>
    %100 = tpu.matmul %56, %99, %cst_77 {dimension_numbers = #tpu.dot_dimension_numbers<[1], [0], [0], [1], [0, 0, 1, 1], [], []>} : vector<8x72xf32>, vector<72x256xf32>, vector<8x256xf32> -> vector<8x256xf32>
    %101 = vector.broadcast %57 : vector<8x1xf32> to vector<8x256xf32>
    %102 = arith.addf %100, %101 : vector<8x256xf32>
    %cst_78 = arith.constant 0.000000e+00 : f32
    %103 = vector.broadcast %cst_78 : f32 to vector<8x256xf32>
    %104 = arith.cmpf oge, %102, %103 : vector<8x256xf32>
    %cst_79 = arith.constant 1.000000e-01 : f32
    %105 = vector.broadcast %cst_79 : f32 to vector<8x256xf32>
    %106 = arith.mulf %105, %102 : vector<8x256xf32>
    %107 = arith.select %104, %102, %106 : vector<8x256xi1>, vector<8x256xf32>
    %108 = arith.addf %107, %50 : vector<8x256xf32>
    %c0_80 = arith.constant 0 : index
    %c0_81 = arith.constant 0 : index
    %c0_82 = arith.constant 0 : index
    %109 = vector.load %arg7[%c0_80, %c0_81, %c0_82] : memref<1x8x256xf32, #tpu.memory_space<vmem>>, vector<1x8x256xf32>
    %110 = vector.shape_cast %109 : vector<1x8x256xf32> to vector<8x256xf32>
    %111 = vector.shape_cast %108 : vector<8x256xf32> to vector<1x8x256xf32>
    tpu.vector_store %arg7[%c0_80, %c0_81, %c0_82], %111 {strides = array<i32>} : memref<1x8x256xf32, #tpu.memory_space<vmem>>, vector<1x8x256xf32>,
    return
  }
  func.func @transform_0(%arg0: i32) -> (i32, i32, i32) {
    %c0_i32 = arith.constant 0 : i32
    %c0_i32_0 = arith.constant 0 : i32
    %c0_i32_1 = arith.constant 0 : i32
    return %arg0, %c0_i32, %c0_i32_0 : i32, i32, i32
  }
  func.func @transform_1(%arg0: i32) -> (i32, i32) {
    %c0_i32 = arith.constant 0 : i32
    %c0_i32_0 = arith.constant 0 : i32
    %c0_i32_1 = arith.constant 0 : i32
    return %c0_i32, %c0_i32_0 : i32, i32
  }
  func.func @transform_2(%arg0: i32) -> (i32, i32) {
    %c0_i32 = arith.constant 0 : i32
    %c0_i32_0 = arith.constant 0 : i32
    %c0_i32_1 = arith.constant 0 : i32
    return %c0_i32, %c0_i32_0 : i32, i32
  }
  func.func @transform_3(%arg0: i32) -> (i32, i32) {
    %c0_i32 = arith.constant 0 : i32
    %c0_i32_0 = arith.constant 0 : i32
    %c0_i32_1 = arith.constant 0 : i32
    return %c0_i32, %c0_i32_0 : i32, i32
  }
  func.func @transform_4(%arg0: i32) -> (i32, i32) {
    %c0_i32 = arith.constant 0 : i32
    %c0_i32_0 = arith.constant 0 : i32
    %c0_i32_1 = arith.constant 0 : i32
    return %c0_i32, %c0_i32_0 : i32, i32
  }
  func.func @transform_5(%arg0: i32) -> (i32, i32) {
    %c0_i32 = arith.constant 0 : i32
    %c0_i32_0 = arith.constant 0 : i32
    %c0_i32_1 = arith.constant 0 : i32
    return %c0_i32, %c0_i32_0 : i32, i32
  }
  func.func @transform_6(%arg0: i32) -> (i32, i32, i32) {
    %c0_i32 = arith.constant 0 : i32
    %c0_i32_0 = arith.constant 0 : i32
    %c0_i32_1 = arith.constant 0 : i32
    return %arg0, %c0_i32, %c0_i32_0 : i32, i32, i32
  }
}

</mosaic_0001>

<bundles_post_ra>
// kernel: tpu_custom_call.1
= control target key start
LH: loop header
LB: loop body
LE: loop exit
PB: predicated region body
PF: predicated region fallthrough
CT: control target
= control target key end

     0   :  { %6 = vsyncpa [#allocation3], 0  ;;  %s118_s0 = inlined_call_operand.hbm [shape: f32[8,128], index: 0, kind: input, shape index: {}]   ;;  %s119_s1 = inlined_call_operand.hbm [shape: f32[8,128], index: 1, kind: output, shape index: {}]  }
   0x1   :  { %7 = vsyncpa [#allocation4], 0  ;;  %s13_s8 = sshll.u32 %s118_s0, 4  ;;  %s99_s9 = smov [#allocation2]   ;;  %s14_s8 = int_to_ptr.hbm [resolvable:$true] %s13_s8 }
   0x2   :  { %s15_s10 = sshll.u32 %s99_s9, 4  ;;  %s16_s10 = int_to_ptr.vmem [resolvable:$true] %s15_s10 }
   0x3   :  { %18 = dma.hbm_to_vmem [thread:$0]  %s14_s8, 128, %s16_s10, [#allocation3]  }
   0x4   :  { %95 = dma.done.wait [#allocation3], 128  }
   0x5   :  { %96 = vsyncadd [#allocation3], 4294967168  ;;  %v23_v0 = vld [vmem:[#allocation2] sm:$0xff]  ;;  %s100_s11 = smov 1   ;;  %s101_s12 = smov [#allocation5]  }
   0x6   :  { %24 = vrot.lane.b32.xlu0 %v23_v0, %s100_s11  ;;  %s32_s13 = sshll.u32 %s101_s12, 4  ;;  %s34_s16 = sshll.u32 %s119_s1, 4  ;;  %s33_s13 = int_to_ptr.vmem [resolvable:$true] %s32_s13  ;;  %s35_s16 = int_to_ptr.hbm [resolvable:$true] %s34_s16 }
  0x78   :  { %v25_v1 = vpop.permute.xlu0 %24 }
  0x79   :  { %26 = vst [vmem:[#allocation5] sm:$0xff] %v25_v1 }
  0x7a   :  { %37 = dma.vmem_to_hbm [thread:$0]  %s33_s13, 128, %s35_s16, [#allocation4]  }
  0x7b   :  { %97 = dma.done.wait [#allocation4], 128  }
  0x7c   :  { %98 = vsyncadd [#allocation4], 4294967168 }
  0x7d   :  { %42 = vsyncpa [#allocation3], 1 }
  0x7e   :  { %43 = vsyncpa [#allocation4], 1 }

// kernel: _unet_conv_block_impl.1
= control target key start
LH: loop header
LB: loop body
LE: loop exit
PB: predicated region body
PF: predicated region fallthrough
CT: control target
= control target key end

     0   :  { %s859_s21 = smov 0   ;;  %s1105_s0 = inlined_call_operand.vmem [shape: f32[2,8,256], index: 0, kind: input, shape index: {}]   ;;  %s1106_s1 = inlined_call_operand.vmem [shape: f32[8,256], index: 1, kind: input, shape index: {}]   ;;  %s1107_s2 = inlined_call_operand.vmem [shape: f32[16,72], index: 2, kind: input, shape index: {}]   ;;  %s1108_s3 = inlined_call_operand.vmem [shape: f32[16,1], index: 3, kind: input, shape index: {}]   ;;  %s1109_s4 = inlined_call_operand.vmem [shape: f32[8,72], index: 4, kind: input, shape index: {}]   ;;  %s1110_s5 = inlined_call_operand.vmem [shape: f32[8,1], index: 5, kind: input, shape index: {}]   ;;  %s1111_s6 = inlined_call_operand.vmem [shape: f32[2,8,256], index: 6, kind: output, shape index: {}]  }
   0x1 LB: > { %s755_s22 = sadd.s32 4294967295, %s813_s21   ;;  %p759_p0 = scmp.ge.s32.totalorder %s813_s21, 1  ;;  %s813_s21 = sphi %s859_s21, %s16_s21  }
   0x2   : > { %p212_p1 = scmp.lt.s32.totalorder %s813_s21, 3 }
   0x4   : > { %p213_p2 = pnand %p759_p0, %p212_p1 }
   0x5   : > { %p242_p3 = scmp.lt.s32.totalorder (!%p213_p2), %s755_s22, 1  ;;  %s815_s27 = smov (!%p213_p2), 112  }
   0x6   : > { %216 = sbr.rel (%p213_p2) target bundleno = 600 (0x258), region = 44  ;;  %s816_s28 = smov (!%p213_p2), 111  }
   0x7   : > { %s817_s29 = smov (!%p213_p2), 113   ;;  %s818_s30 = smov (!%p213_p2), 127  }
   0x8   : > { %s819_s7 = smov (!%p213_p2), 1   ;;  %s820_s8 = smov (!%p213_p2), 15  }
   0x9   : > { %s821_s9 = smov (!%p213_p2), 16   ;;  %s822_s10 = smov (!%p213_p2), 17  }
   0xb   : > { %s1113_s22 = smov (!%p242_p3, %s755_s22), 1  ;;  %v262_v3 = vlaneseq  ;;  %v770_v7 = vld [vmem:[%s1106_s1 + $0x7] ss:$8 sm:$0x3]  ;;  %v823_v36 = vmov 0   ;;  %vm433_vm8 = vcmask 588800  }
   0xc   : > { %s786_s23 = sshll.u32 %s1113_s22, 4  ;;  %v769_v9 = vld [vmem:[%s1106_s1 + $0x6] ss:$8 sm:$0x3]  ;;  %v397_v10 = vperm.slane %v770_v7, 0  ;;  %v398_v11 = vperm.slane %v770_v7, 1  ;;  %805 = vset.pattern.permute.xlu1 %v823_v36  ;;  %806 = vset.pattern.permute.xlu0 %v823_v36 }
   0xd   : > { %s246_s26 = scalar_lea.vmem %s1105_s0, %s786_s23  ;;  %v911_v6 = vand.u32 127, %v262_v3  ;;  %v768_v12 = vld [vmem:[%s1106_s1 + $0x5] ss:$8 sm:$0x3]  ;;  %v379_v15 = vperm.slane %v769_v9, 0  ;;  %v380_v16 = vperm.slane %v769_v9, 1 }
   0xe   : > { %v875_v0 = vld [vmem:[%s246_s26] sm:$0xff]  ;;  %v883_v1 = vld [vmem:[%s246_s26 + $0x8] sm:$0xff]  ;;  %v361_v23 = vperm.slane %v768_v12, 0  ;;  %v362_v24 = vperm.slane %v768_v12, 1 }
   0xf   : > { %369 = vrot.lane.b32.xlu1 %v875_v0, %s815_s27  ;;  %387 = vrot.lane.b32.xlu0 %v875_v0, %s816_s28  ;;  %vm373_vm0 = vcmp.lt.s32.totalorder %v911_v6, 112  ;;  %vm391_vm1 = vcmp.lt.s32.totalorder %v911_v6, 111  ;;  %vm355_vm2 = vcmp.lt.s32.totalorder %v911_v6, 113  ;;  %v767_v27 = vld [vmem:[%s1106_s1 + $0x4] ss:$8 sm:$0x3] }
  0x10   : > { %351 = vrot.lane.b32.xlu2 %v875_v0, %s817_s29  ;;  %vm337_vm3 = vcmp.lt.s32.totalorder %v911_v6, 127  ;;  %v343_v33 = vperm.slane %v767_v27, 0  ;;  %v344_v34 = vperm.slane %v767_v27, 1  ;;  %v256_v35 = vld [vmem:[%s1108_s3] sm:$0xff]  ;;  %vm317_vm4 = vcmp.lt.s32.totalorder %v911_v6, 1 }
  0x11   : > { %v766_v43 = vld [vmem:[%s1106_s1 + $0x3] ss:$8 sm:$0x3]  ;;  %v765_v44 = vld [vmem:[%s1106_s1 + $0x2] ss:$8 sm:$0x3] }
  0x12   : > { %v323_v45 = vperm.slane %v766_v43, 0  ;;  %v324_v46 = vperm.slane %v766_v43, 1  ;;  %vm299_vm5 = vcmp.lt.s32.totalorder %v911_v6, 15  ;;  %v305_v48 = vperm.slane %v765_v44, 0 }
  0x13   : > { %v306_v49 = vperm.slane %v765_v44, 1  ;;  %v764_v60 = vld [vmem:[%s1106_s1 + $0x1] ss:$8 sm:$0x3]  ;;  %vm281_vm6 = vcmp.lt.s32.totalorder %v911_v6, 16  ;;  %vm264_vm7 = vcmp.lt.s32.totalorder %v911_v6, 17 }
  0x14   : > { %v287_v61 = vperm.slane %v764_v60, 0  ;;  %v288_v62 = vperm.slane %v764_v60, 1  ;;  %v779_v44 = vld [vmem:[%s1106_s1 + $0x5] ss:$8 sm:$0x3] }
  0x17   : > { %371 = vrot.lane.b32.xlu1 %v883_v1, %s815_s27  ;;  %389 = vrot.lane.b32.xlu0 %v883_v1, %s816_s28 }
  0x18   : > { %353 = vrot.lane.b32.xlu2 %v883_v1, %s817_s29 }
  0x1f   : > { %335 = vrot.lane.b32.xlu1 %v883_v1, %s818_s30  ;;  %333 = vrot.lane.b32.xlu0 %v875_v0, %s818_s30 }
  0x20   : > { %313 = vrot.lane.b32.xlu2 %v875_v0, %s819_s7 }
  0x27   : > { %295 = vrot.lane.b32.xlu1 %v875_v0, %s820_s8  ;;  %315 = vrot.lane.b32.xlu0 %v883_v1, %s819_s7 }
  0x28   : > { %297 = vrot.lane.b32.xlu2 %v883_v1, %s820_s8 }
  0x2f   : > { %279 = vrot.lane.b32.xlu1 %v883_v1, %s821_s9  ;;  %277 = vrot.lane.b32.xlu0 %v875_v0, %s821_s9 }
  0x30   : > { %258 = vrot.lane.b32.xlu2 %v875_v0, %s822_s10 }
  0x37   : > { %260 = vrot.lane.b32.xlu0 %v883_v1, %s822_s10  ;;  %425 = vperm.xlu1 %805, %v256_v35  }
  0x6a   : > { %v352_v2 = vpop.permute.xlu2 %351 }
  0x72   : > { %v354_v8 = vpop.permute.xlu2 %353 }
  0x73   : > { %v356_v25 = vsel %vm355_vm2, %v352_v2, %v354_v8  ;;  %v357_v26 = vsel %vm355_vm2, %v354_v8, %v352_v2 }
  0x74   : > { %v365_v31 = vmul.f32 %v361_v23, %v356_v25  ;;  %v366_v32 = vmul.f32 %v362_v24, %v357_v26  ;;  %v257_v26 = vld [vmem:[%s1108_s3 + $0x8] sm:$0xff] }
  0x7a   : > { %v314_v30 = vpop.permute.xlu2 %313 }
  0x81   : > { %v370_v4 = vpop.permute.xlu1 %369  ;;  %v388_v5 = vpop.permute.xlu0 %387 }
  0x82   : > { %v298_v47 = vpop.permute.xlu2 %297 }
  0x89   : > { %v372_v13 = vpop.permute.xlu1 %371  ;;  %v390_v14 = vpop.permute.xlu0 %389 }
  0x8a   : > { %v374_v17 = vsel %vm373_vm0, %v370_v4, %v372_v13  ;;  %v375_v18 = vsel %vm373_vm0, %v372_v13, %v370_v4  ;;  %v392_v19 = vsel %vm391_vm1, %v388_v5, %v390_v14  ;;  %v393_v20 = vsel %vm391_vm1, %v390_v14, %v388_v5  ;;  %v267_v5 = vld [vmem:[%s1106_s1] ss:$8 sm:$0x3]  ;;  %v259_v7 = vpop.permute.xlu2 %258 }
  0x8b   : > { %v401_v21 = vmul.f32 %v397_v10, %v392_v19  ;;  %v402_v22 = vmul.f32 %v398_v11, %v393_v20  ;;  %v383_v28 = vmul.f32 %v379_v15, %v374_v17  ;;  %v384_v29 = vmul.f32 %v380_v16, %v375_v18  ;;  %v254_v15 = vld [vmem:[%s1107_s2] sm:$0xff]  ;;  %v255_v17 = vld [vmem:[%s1107_s2 + $0x8] sm:$0xff] }
  0x8c   : > { %v269_v8 = vperm.slane %v267_v5, 0  ;;  %v270_v9 = vperm.slane %v267_v5, 1 }
  0x8d   : > { %447 = vmatpush.msra.mxu0 %v401_v21  ;;  %470 = vmatpush.msra.mxu1 %v402_v22 }
  0x8f   : > { %448 = vmatpush.msra.mxu0 %v383_v28  ;;  %471 = vmatpush.msra.mxu1 %v384_v29  ;;  %v781_v29 = vld [vmem:[%s1106_s1 + $0x7] ss:$8 sm:$0x3] }
  0x91   : > { %v336_v37 = vpop.permute.xlu1 %335  ;;  %449 = vmatpush.msra.mxu0 %v365_v31  ;;  %472 = vmatpush.msra.mxu1 %v366_v32  ;;  %v334_v38 = vpop.permute.xlu0 %333  ;;  %v616_v31 = vperm.slane %v781_v29, 0  ;;  %v617_v32 = vperm.slane %v781_v29, 1 }
  0x92   : > { %v338_v39 = vsel %vm337_vm3, %v334_v38, %v336_v37  ;;  %v339_v40 = vsel %vm337_vm3, %v336_v37, %v334_v38 }
  0x93   : > { %v347_v41 = vmul.f32 %v343_v33, %v338_v39  ;;  %v348_v42 = vmul.f32 %v344_v34, %v339_v40 }
  0x95   : > { %450 = vmatpush.msra.mxu0 %v347_v41  ;;  %473 = vmatpush.msra.mxu1 %v348_v42 }
  0x97   : > { %451 = vmatpush.msra.mxu0 %v875_v0  ;;  %474 = vmatpush.msra.mxu1 %v883_v1 }
  0x99   : > { %v296_v50 = vpop.permute.xlu1 %295  ;;  %v316_v51 = vpop.permute.xlu0 %315 }
  0x9a   : > { %v318_v52 = vsel %vm317_vm4, %v314_v30, %v316_v51  ;;  %v319_v53 = vsel %vm317_vm4, %v316_v51, %v314_v30  ;;  %v300_v54 = vsel %vm299_vm5, %v296_v50, %v298_v47  ;;  %v301_v55 = vsel %vm299_vm5, %v298_v47, %v296_v50  ;;  %v780_v30 = vld [vmem:[%s1106_s1 + $0x6] ss:$8 sm:$0x3] }
  0x9b   : > { %v327_v56 = vmul.f32 %v323_v45, %v319_v53  ;;  %v328_v57 = vmul.f32 %v324_v46, %v318_v52  ;;  %v309_v58 = vmul.f32 %v305_v48, %v301_v55  ;;  %v310_v59 = vmul.f32 %v306_v49, %v300_v54  ;;  %v493_v51 = vld [vmem:[%s1110_s5] sm:$0xff] }
  0x9c   : > { %v600_v35 = vperm.slane %v780_v30, 0  ;;  %v601_v36 = vperm.slane %v780_v30, 1  ;;  %v584_v47 = vperm.slane %v779_v44, 0  ;;  %v585_v48 = vperm.slane %v779_v44, 1 }
  0x9d   : > { %452 = vmatpush.msra.mxu0 %v327_v56  ;;  %475 = vmatpush.msra.mxu1 %v328_v57  ;;  %v778_v56 = vld [vmem:[%s1106_s1 + $0x4] ss:$8 sm:$0x3] }
  0x9f   : > { %453 = vmatpush.msra.mxu0 %v309_v58  ;;  %476 = vmatpush.msra.mxu1 %v310_v59  ;;  %v568_v58 = vperm.slane %v778_v56, 0  ;;  %v569_v59 = vperm.slane %v778_v56, 1 }
  0xa1   : > { %v280_v63 = vpop.permute.xlu1 %279  ;;  %v278_v0 = vpop.permute.xlu0 %277 }
  0xa2   : > { %v282_v1 = vsel %vm281_vm6, %v278_v0, %v280_v63  ;;  %v283_v2 = vsel %vm281_vm6, %v280_v63, %v278_v0 }
  0xa3   : > { %v291_v3 = vmul.f32 %v287_v61, %v283_v2  ;;  %v292_v4 = vmul.f32 %v288_v62, %v282_v1  ;;  %v777_v61 = vld [vmem:[%s1106_s1 + $0x3] ss:$8 sm:$0x3] }
  0xa5   : > { %454 = vmatpush.msra.mxu0 %v291_v3  ;;  %477 = vmatpush.msra.mxu1 %v292_v4  ;;  %v550_v3 = vperm.slane %v777_v61, 0  ;;  %v551_v4 = vperm.slane %v777_v61, 1 }
  0xa9   : > { %v261_v10 = vpop.permute.xlu0 %260  ;;  %v426_v16 = vpop.permute.xlu1 %425 }
  0xaa   : > { %v265_v11 = vsel %vm264_vm7, %v259_v7, %v261_v10  ;;  %v266_v12 = vsel %vm264_vm7, %v261_v10, %v259_v7 }
  0xab   : > { %v273_v13 = vmul.f32 %v269_v8, %v266_v12  ;;  %v274_v14 = vmul.f32 %v270_v9, %v265_v11  ;;  %v776_v8 = vld [vmem:[%s1106_s1 + $0x2] ss:$8 sm:$0x3] }
  0xac   : > { %v534_v12 = vperm.slane %v776_v8, 0 }
  0xad   : > { %455 = vmatpush.msra.mxu0 %v273_v13  ;;  %478 = vmatpush.msra.mxu1 %v274_v14  ;;  %v535_v13 = vperm.slane %v776_v8, 1 }
  0xae   : > { %771 = vmatmul.msk.f32.vlgmr.msra.gmra.mxu0 %vm433_vm8, %v254_v15  ;;  %773 = vmatmul.msk.f32.vlgmr.msra.gmra.mxu1 %vm433_vm8, %v254_v15 }
  0xb6   : > { %772 = vmatmul.msk.f32.gmra.mxu0 %vm433_vm8, %v255_v17  ;;  %774 = vmatmul.msk.f32.gmra.mxu1 %vm433_vm8, %v255_v17 }
 0x12b   : > { %v457_v18 = vpop.f32.mrf.mxu0  ;;  %v480_v19 = vpop.f32.mrf.mxu1 }
 0x12c   : > { %v458_v20 = vadd.f32 %v457_v18, %v426_v16  ;;  %v481_v21 = vadd.f32 %v480_v19, %v426_v16 }
 0x12e   : > { %vm486_vm9 = vcmp.ge.f32.partialorder %v458_v20, 0.0  ;;  %v488_v22 = vmul.f32 0.1, %v458_v20  ;;  %vm487_vm10 = vcmp.ge.f32.partialorder %v481_v21, 0.0  ;;  %v489_v23 = vmul.f32 0.1, %v481_v21 }
 0x130   : > { %v992_v24 = vsel %vm486_vm9, %v458_v20, %v488_v22  ;;  %v994_v25 = vsel %vm487_vm10, %v481_v21, %v489_v23  ;;  %v775_v20 = vld [vmem:[%s1106_s1 + $0x1] ss:$8 sm:$0x3]  ;;  %v500_v21 = vld [vmem:[%s1106_s1] ss:$8 sm:$0x3] }
 0x131   : > { %592 = vrot.lane.b32.xlu1 %v992_v24, %s815_s27  ;;  %608 = vrot.lane.b32.xlu2 %v992_v24, %s816_s28  ;;  %v518_v22 = vperm.slane %v775_v20, 0  ;;  %v519_v23 = vperm.slane %v775_v20, 1 }
 0x132   : > { %610 = vrot.lane.b32.xlu0 %v994_v25, %s816_s28 }
 0x133   : > { %v460_v6 = vpop.f32.mrf.mxu0 }
 0x139   : > { %578 = vrot.lane.b32.xlu1 %v994_v25, %s817_s29  ;;  %594 = vrot.lane.b32.xlu2 %v994_v25, %s815_s27 }
 0x13a   : > { %576 = vrot.lane.b32.xlu0 %v992_v24, %s817_s29 }
 0x141   : > { %542 = vrot.lane.b32.xlu1 %v992_v24, %s819_s7  ;;  %560 = vrot.lane.b32.xlu2 %v992_v24, %s818_s30 }
 0x142   : > { %562 = vrot.lane.b32.xlu0 %v994_v25, %s818_s30  ;;  %s251_s30 = scalar_lea.vmem %s1111_s6, %s786_s23 }
 0x149   : > { %528 = vrot.lane.b32.xlu1 %v994_v25, %s820_s8  ;;  %544 = vrot.lane.b32.xlu2 %v994_v25, %s819_s7 }
 0x14a   : > { %526 = vrot.lane.b32.xlu0 %v992_v24, %s820_s8 }
 0x151   : > { %494 = vrot.lane.b32.xlu1 %v992_v24, %s822_s10  ;;  %510 = vrot.lane.b32.xlu2 %v992_v24, %s821_s9 }
 0x152   : > { %512 = vrot.lane.b32.xlu0 %v994_v25, %s821_s9 }
 0x159   : > { %430 = vperm.xlu1 %805, %v257_v26   ;;  %496 = vrot.lane.b32.xlu2 %v994_v25, %s822_s10 }
 0x15a   : > { %644 = vperm.xlu0 %806, %v493_v51  }
 0x18b   : > { %v609_v27 = vpop.permute.xlu2 %608 }
 0x193   : > { %v595_v28 = vpop.permute.xlu2 %594 }
 0x19b   : > { %v561_v41 = vpop.permute.xlu2 %560 }
 0x1a3   : > { %v593_v33 = vpop.permute.xlu1 %592  ;;  %v545_v57 = vpop.permute.xlu2 %544 }
 0x1a4   : > { %v611_v34 = vpop.permute.xlu0 %610  ;;  %v596_v37 = vsel %vm373_vm0, %v593_v33, %v595_v28  ;;  %v597_v38 = vsel %vm373_vm0, %v595_v28, %v593_v33  ;;  %v503_v28 = vperm.slane %v500_v21, 1 }
 0x1a5   : > { %v612_v39 = vsel %vm391_vm1, %v609_v27, %v611_v34  ;;  %v613_v40 = vsel %vm391_vm1, %v611_v34, %v609_v27  ;;  %v604_v45 = vmul.f32 %v600_v35, %v596_v37  ;;  %v605_v46 = vmul.f32 %v601_v36, %v597_v38  ;;  %v492_v37 = vld [vmem:[%s1109_s4] sm:$0xff] }
 0x1a6   : > { %v620_v42 = vmul.f32 %v616_v31, %v612_v39  ;;  %v621_v43 = vmul.f32 %v617_v32, %v613_v40  ;;  %v502_v27 = vperm.slane %v500_v21, 0 }
 0x1a8   : > { %657 = vmatpush.msra.mxu2 %v620_v42  ;;  %677 = vmatpush.msra.mxu3 %v621_v43 }
 0x1aa   : > { %658 = vmatpush.msra.mxu2 %v604_v45  ;;  %678 = vmatpush.msra.mxu3 %v605_v46 }
 0x1ab   : > { %v579_v49 = vpop.permute.xlu1 %578  ;;  %v511_v9 = vpop.permute.xlu2 %510 }
 0x1ac   : > { %v577_v50 = vpop.permute.xlu0 %576 }
 0x1ad   : > { %v580_v52 = vsel %vm355_vm2, %v577_v50, %v579_v49  ;;  %v581_v53 = vsel %vm355_vm2, %v579_v49, %v577_v50 }
 0x1ae   : > { %v588_v54 = vmul.f32 %v584_v47, %v580_v52  ;;  %v589_v55 = vmul.f32 %v585_v48, %v581_v53 }
 0x1b0   : > { %659 = vmatpush.msra.mxu2 %v588_v54  ;;  %679 = vmatpush.msra.mxu3 %v589_v55 }
 0x1b3   : > { %v543_v60 = vpop.permute.xlu1 %542 }
 0x1b4   : > { %v563_v62 = vpop.permute.xlu0 %562  ;;  %v546_v5 = vsel %vm317_vm4, %v543_v60, %v545_v57  ;;  %v547_v7 = vsel %vm317_vm4, %v545_v57, %v543_v60 }
 0x1b5   : > { %v564_v63 = vsel %vm337_vm3, %v561_v41, %v563_v62  ;;  %v565_v0 = vsel %vm337_vm3, %v563_v62, %v561_v41  ;;  %v554_v10 = vmul.f32 %v550_v3, %v547_v7  ;;  %v555_v11 = vmul.f32 %v551_v4, %v546_v5  ;;  %v483_v41 = vpop.f32.mrf.mxu1 }
 0x1b6   : > { %v572_v1 = vmul.f32 %v568_v58, %v564_v63  ;;  %v573_v2 = vmul.f32 %v569_v59, %v565_v0 }
 0x1b8   : > { %660 = vmatpush.msra.mxu2 %v572_v1  ;;  %680 = vmatpush.msra.mxu3 %v573_v2 }
 0x1ba   : > { %661 = vmatpush.msra.mxu2 %v992_v24  ;;  %681 = vmatpush.msra.mxu3 %v994_v25  ;;  %v497_v25 = vpop.permute.xlu2 %496 }
 0x1bb   : > { %v529_v14 = vpop.permute.xlu1 %528 }
 0x1bc   : > { %662 = vmatpush.msra.mxu2 %v554_v10  ;;  %682 = vmatpush.msra.mxu3 %v555_v11  ;;  %v527_v15 = vpop.permute.xlu0 %526 }
 0x1bd   : > { %v530_v16 = vsel %vm299_vm5, %v527_v15, %v529_v14  ;;  %v531_v17 = vsel %vm299_vm5, %v529_v14, %v527_v15 }
 0x1be   : > { %v538_v18 = vmul.f32 %v534_v12, %v531_v17  ;;  %v539_v19 = vmul.f32 %v535_v13, %v530_v16 }
 0x1c0   : > { %663 = vmatpush.msra.mxu2 %v538_v18  ;;  %683 = vmatpush.msra.mxu3 %v539_v19 }
 0x1c3   : > { %v495_v24 = vpop.permute.xlu1 %494 }
 0x1c4   : > { %v513_v26 = vpop.permute.xlu0 %512  ;;  %v498_v29 = vsel %vm264_vm7, %v495_v24, %v497_v25  ;;  %v499_v30 = vsel %vm264_vm7, %v497_v25, %v495_v24 }
 0x1c5   : > { %v514_v31 = vsel %vm281_vm6, %v511_v9, %v513_v26  ;;  %v515_v32 = vsel %vm281_vm6, %v513_v26, %v511_v9  ;;  %v506_v35 = vmul.f32 %v502_v27, %v499_v30  ;;  %v507_v36 = vmul.f32 %v503_v28, %v498_v29 }
 0x1c6   : > { %v522_v33 = vmul.f32 %v518_v22, %v515_v32  ;;  %v523_v34 = vmul.f32 %v519_v23, %v514_v31 }
 0x1c8   : > { %664 = vmatpush.msra.mxu2 %v522_v33  ;;  %684 = vmatpush.msra.mxu3 %v523_v34 }
 0x1ca   : > { %665 = vmatpush.msra.mxu2 %v506_v35  ;;  %685 = vmatpush.msra.mxu3 %v507_v36 }
 0x1cb   : > { %782 = vmatmul.msk.f32.vlgmr.msra.gmra.mxu2 %vm433_vm8, %v492_v37  ;;  %783 = vmatmul.msk.f32.vlgmr.msra.gmra.mxu3 %vm433_vm8, %v492_v37  ;;  %v431_v42 = vpop.permute.xlu1 %430 }
 0x1cc   : > { %v645_v38 = vpop.permute.xlu0 %644  ;;  %v461_v47 = vadd.f32 %v460_v6, %v431_v42  ;;  %v484_v48 = vadd.f32 %v483_v41, %v431_v42 }
 0x24e   : > { %v667_v39 = vpop.f32.mrf.mxu2  ;;  %v687_v40 = vpop.f32.mrf.mxu3 }
 0x24f   : > { %v668_v43 = vadd.f32 %v667_v39, %v645_v38  ;;  %v688_v44 = vadd.f32 %v687_v40, %v645_v38 }
 0x251   : > { %vm690_vm11 = vcmp.ge.f32.partialorder %v668_v43, 0.0  ;;  %vm691_vm12 = vcmp.ge.f32.partialorder %v688_v44, 0.0  ;;  %v692_v45 = vmul.f32 0.1, %v668_v43  ;;  %v693_v46 = vmul.f32 0.1, %v688_v44 }
 0x253   : > { %v694_v49 = vsel %vm690_vm11, %v668_v43, %v692_v45  ;;  %v695_v50 = vsel %vm691_vm12, %v688_v44, %v693_v46 }
 0x254   : > { %v696_v51 = vadd.f32 %v694_v49, %v461_v47  ;;  %v697_v52 = vadd.f32 %v695_v50, %v484_v48 }
 0x256   : > { %698 = vst [vmem:[%s251_s30] sm:$0xff] %v696_v51 }
 0x257   : > { %699 = vst [vmem:[%s251_s30 + $0x8] sm:$0xff] %v697_v52 }
 0x258 PF: > { %s16_s21 = sadd.s32 1, %s813_s21  }
 0x259   : > { %p13_p4 = scmp.ge.s32.totalorder %s16_s21, 4  }
 0x25b   :  { %15 = sbr.rel (!%p13_p4) target bundleno = 1 (0x1), region = 81 }

</bundles_post_ra>
